<compile_context>
chip_gen: v5e
topology: v5e:2x2
jax: 0.10.0
libtpu: 0.0.40
codegen_flags: <defaults>
</compile_context>

<pallas_src>
import functools

import jax
import jax.numpy as jnp
from jax.experimental import pallas as pl
from jax.experimental.pallas import tpu as pltpu

_LANE = 128     # lane width (last dim of a vreg)
_SUBLANE = 8    # sublane count (second-to-last dim of a vreg)


def _round_up(x, m):
    return (x + m - 1) // m * m


# ----------------------------- Pallas kernel ------------------------------ #
def _dqn_kernel(n_hidden_layers,
                x_ref, w_in_ref, b_in_ref,
                w_h_ref, b_h_ref,
                w_out_ref, b_out_ref,
                o_ref):
    cdt = w_in_ref.dtype  # matmul operand dtype (bf16); accumulation is f32

    # fc_in + ReLU (bias add / ReLU kept in f32)
    h = jnp.dot(x_ref[...], w_in_ref[...],
                preferred_element_type=jnp.float32) + b_in_ref[...]
    h = jnp.maximum(h, 0.0)

    # hidden layers: static trip count -> unrolled at trace time (full LLO
    # scheduler visibility; layers are serially data-dependent anyway).
    for l in range(n_hidden_layers):
        h = jnp.dot(h.astype(cdt), w_h_ref[l],
                    preferred_element_type=jnp.float32) + b_h_ref[l]
        h = jnp.maximum(h, 0.0)

    # fc_out (no activation); output tile is lane-dense (last dim padded to 128)
    o_ref[...] = (jnp.dot(h.astype(cdt), w_out_ref[...],
                          preferred_element_type=jnp.float32)
                  + b_out_ref[...]).astype(o_ref.dtype)


# ------------------------------- wrapper ----------------------------------- #
def dqn_forward(x, params, *, block_batch=512, compute_dtype=jnp.bfloat16):
    """Fused DQN MLP forward.  x: [B, n_obs] float32 -> [B, n_action] float32."""
    w_in, b_in, w_h, b_h, w_out, b_out = params
    B, n_obs = x.shape
    n_hidden = w_in.shape[1]
    n_action = w_out.shape[1]
    n_hidden_layers = w_h.shape[0]

    # Lane-dense padded feature sizes (multiples of 128).
    n_obs_p = _round_up(n_obs, _LANE)
    n_hid_p = _round_up(n_hidden, _LANE)
    n_act_p = _round_up(n_action, _LANE)

    # Batch tile: multiple of 8 sublanes, capped at block_batch (>=512 rows
    # amortizes per-step overhead at training/eval batch sizes).
    tb = min(block_batch, _round_up(B, _SUBLANE))
    b_p = _round_up(B, tb)

    # Zero-pad + cast operands once in the wrapper. Zero-padded weight
    # rows/cols and zero-padded biases leave the valid outputs exact.
    xp = jnp.zeros((b_p, n_obs_p), compute_dtype
                   ).at[:B, :n_obs].set(x.astype(compute_dtype))
    w_in_p = jnp.zeros((n_obs_p, n_hid_p), compute_dtype
                       ).at[:n_obs, :n_hidden].set(w_in.astype(compute_dtype))
    b_in_p = jnp.zeros((1, n_hid_p), jnp.float32).at[:, :n_hidden].set(b_in)

    # Guard the dqn_n_layer == 1 edge case: never pass a zero-size array.
    n_layers_alloc = max(n_hidden_layers, 1)
    w_h_p = jnp.zeros((n_layers_alloc, n_hid_p, n_hid_p), compute_dtype)
    b_h_p = jnp.zeros((n_layers_alloc, 1, n_hid_p), jnp.float32)
    if n_hidden_layers > 0:
        w_h_p = w_h_p.at[:n_hidden_layers, :n_hidden, :n_hidden].set(
            w_h.astype(compute_dtype))
        b_h_p = b_h_p.at[:n_hidden_layers, :, :n_hidden].set(b_h)

    w_out_p = jnp.zeros((n_hid_p, n_act_p), compute_dtype
                        ).at[:n_hidden, :n_action].set(w_out.astype(compute_dtype))
    b_out_p = jnp.zeros((1, n_act_p), jnp.float32).at[:, :n_action].set(b_out)

    kernel = functools.partial(_dqn_kernel, n_hidden_layers)

    const2 = lambda i: (0, 0)        # weights/biases: DMA once, VMEM-resident
    const3 = lambda i: (0, 0, 0)

    # VMEM budget (v7x: 64 MiB physical / 32 MiB default scoped), counting
    # double buffers: 2*tb*n_obs_p*2B + 2*tb*n_act_p*4B + weights (~O(100 KiB))
    # -> well under the default limit for tb<=512, so no explicit
    # vmem_limit_bytes needed here; re-derive if n_hidden grows.
    out = pl.pallas_call(
        kernel,
        out_shape=jax.ShapeDtypeStruct((b_p, n_act_p), jnp.float32),
        grid=(b_p // tb,),
        in_specs=[
            pl.BlockSpec((tb, n_obs_p), lambda i: (i, 0)),          # x (tiled)
            pl.BlockSpec((n_obs_p, n_hid_p), const2),               # w_in
            pl.BlockSpec((1, n_hid_p), const2),                     # b_in
            pl.BlockSpec((n_layers_alloc, n_hid_p, n_hid_p), const3),  # w_h
            pl.BlockSpec((n_layers_alloc, 1, n_hid_p), const3),        # b_h
            pl.BlockSpec((n_hid_p, n_act_p), const2),               # w_out
            pl.BlockSpec((1, n_act_p), const2),                     # b_out
        ],
        out_specs=pl.BlockSpec((tb, n_act_p), lambda i: (i, 0)),
        compiler_params=pltpu.CompilerParams(
            dimension_semantics=("parallel",),   # shard batch across v7x's 2 TCs
        ),
    )(xp, w_in_p, b_in_p, w_h_p, b_h_p, w_out_p, b_out_p)

    return out[:B, :n_action]


# --------------------------- parameter creation ---------------------------- #
def init_params(key, n_observation, n_hidden, n_action, n_layer):
    """Deterministic synthetic params (shapes match the PyTorch module)."""
    n_hidden_layers = n_layer - 1
    ks = jax.random.split(key, 6)
    scale = 0.1
    w_in = scale * jax.random.normal(ks[0], (n_observation, n_hidden), jnp.float32)
    b_in = scale * jax.random.normal(ks[1], (1, n_hidden), jnp.float32)
    w_h = scale * jax.random.normal(ks[2], (n_hidden_layers, n_hidden, n_hidden), jnp.float32)
    b_h = scale * jax.random.normal(ks[3], (n_hidden_layers, 1, n_hidden), jnp.float32)
    w_out = scale * jax.random.normal(ks[4], (n_hidden, n_action), jnp.float32)
    b_out = scale * jax.random.normal(ks[5], (1, n_action), jnp.float32)
    return w_in, b_in, w_h, b_h, w_out, b_out


def dqn_reference(x, params, compute_dtype=jnp.bfloat16):
    """Plain-JAX reference that mimics the kernel's bf16-operand / f32-accum path."""
    cast = lambda a: a.astype(compute_dtype).astype(jnp.float32)
    w_in, b_in, w_h, b_h, w_out, b_out = params
    h = jnp.maximum(cast(x) @ cast(w_in) + b_in, 0.0)
    for l in range(w_h.shape[0]):
        h = jnp.maximum(cast(h) @ cast(w_h[l]) + b_h[l], 0.0)
    return cast(h) @ cast(w_out) + b_out


# --------------------------------- main ------------------------------------ #
if __name__ == "__main__":
    # args: n_channel=4, n_power_level=2 -> n_observation = n_action = 8
    #       dqn_n_hidden=32, dqn_n_layer=3 -> 2 hidden (fc_hiddens) layers
    n_channel, n_power_level = 4, 2
    n_observation = n_channel * n_power_level
    n_action = n_channel * n_power_level
    dqn_n_hidden = 32
    dqn_n_layer = 3
    batch = 2

    key = jax.random.PRNGKey(0)
    k_x, k_p = jax.random.split(key)

    x = jax.random.normal(k_x, (batch, n_observation), jnp.float32)
    params = init_params(k_p, n_observation, dqn_n_hidden, n_action, dqn_n_layer)

    out = dqn_forward(x, params)
    out = jax.block_until_ready(out)

    ref = dqn_reference(x, params)
    assert out.shape == (batch, n_action)
    assert jnp.allclose(out, ref, atol=1e-4, rtol=1e-3), "mismatch vs reference"

    print("KERNEL_OK")
</pallas_src>

<mosaic_0001>
module attributes {stable_mosaic.version = 11 : i64} {
  func.func @_dqn_kernel(%arg0: i32, %arg1: memref<8x128xbf16, #tpu.memory_space<vmem>>, %arg2: memref<128x128xbf16, #tpu.memory_space<vmem>>, %arg3: memref<1x128xf32, #tpu.memory_space<vmem>>, %arg4: memref<2x128x128xbf16, #tpu.memory_space<vmem>>, %arg5: memref<2x1x128xf32, #tpu.memory_space<vmem>>, %arg6: memref<128x128xbf16, #tpu.memory_space<vmem>>, %arg7: memref<1x128xf32, #tpu.memory_space<vmem>>, %arg8: memref<8x128xf32, #tpu.memory_space<vmem>>) attributes {dimension_semantics = [#tpu.dimension_semantics<parallel>], iteration_bounds = array<i64: 1>, scalar_prefetch = 0 : i64, scratch_operands = 0 : i64, tpu.core_type = #tpu.core_type<tc>, window_params = [{transform_indices = @transform_0, window_bounds = array<i64: 8, 128>}, {pipeline_mode = #tpu.pipeline_mode<synchronous>, transform_indices = @transform_1, window_bounds = array<i64: 128, 128>}, {pipeline_mode = #tpu.pipeline_mode<synchronous>, transform_indices = @transform_2, window_bounds = array<i64: 1, 128>}, {pipeline_mode = #tpu.pipeline_mode<synchronous>, transform_indices = @transform_3, window_bounds = array<i64: 2, 128, 128>}, {pipeline_mode = #tpu.pipeline_mode<synchronous>, transform_indices = @transform_4, window_bounds = array<i64: 2, 1, 128>}, {pipeline_mode = #tpu.pipeline_mode<synchronous>, transform_indices = @transform_5, window_bounds = array<i64: 128, 128>}, {pipeline_mode = #tpu.pipeline_mode<synchronous>, transform_indices = @transform_6, window_bounds = array<i64: 1, 128>}, {transform_indices = @transform_7, window_bounds = array<i64: 8, 128>}]} {
    %c0 = arith.constant 0 : index
    %c0_0 = arith.constant 0 : index
    %0 = vector.load %arg1[%c0, %c0_0] : memref<8x128xbf16, #tpu.memory_space<vmem>>, vector<8x128xbf16>
    %c0_1 = arith.constant 0 : index
    %c0_2 = arith.constant 0 : index
    %1 = vector.load %arg2[%c0_1, %c0_2] : memref<128x128xbf16, #tpu.memory_space<vmem>>, vector<128x128xbf16>
    %cst = arith.constant dense<0.000000e+00> : vector<8x128xf32>
    %2 = tpu.matmul %0, %1, %cst {dimension_numbers = #tpu.dot_dimension_numbers<[1], [0], [0], [1], [0, 0, 1, 1], [], []>} : vector<8x128xbf16>, vector<128x128xbf16>, vector<8x128xf32> -> vector<8x128xf32>
    %c0_3 = arith.constant 0 : index
    %c0_4 = arith.constant 0 : index
    %3 = vector.load %arg3[%c0_3, %c0_4] : memref<1x128xf32, #tpu.memory_space<vmem>>, vector<1x128xf32>
    %4 = vector.broadcast %3 : vector<1x128xf32> to vector<8x128xf32>
    %5 = arith.addf %2, %4 : vector<8x128xf32>
    %cst_5 = arith.constant 0.000000e+00 : f32
    %6 = vector.broadcast %cst_5 : f32 to vector<8x128xf32>
    %7 = arith.maximumf %5, %6 : vector<8x128xf32>
    %8 = arith.truncf %7 : vector<8x128xf32> to vector<8x128xbf16>
    %c0_6 = arith.constant 0 : index
    %c0_7 = arith.constant 0 : index
    %c0_8 = arith.constant 0 : index
    %9 = vector.load %arg4[%c0_6, %c0_7, %c0_8] : memref<2x128x128xbf16, #tpu.memory_space<vmem>>, vector<1x128x128xbf16>
    %10 = vector.shape_cast %9 : vector<1x128x128xbf16> to vector<128x128xbf16>
    %cst_9 = arith.constant dense<0.000000e+00> : vector<8x128xf32>
    %11 = tpu.matmul %8, %10, %cst_9 {dimension_numbers = #tpu.dot_dimension_numbers<[1], [0], [0], [1], [0, 0, 1, 1], [], []>} : vector<8x128xbf16>, vector<128x128xbf16>, vector<8x128xf32> -> vector<8x128xf32>
    %c0_10 = arith.constant 0 : index
    %c0_11 = arith.constant 0 : index
    %c0_12 = arith.constant 0 : index
    %12 = vector.load %arg5[%c0_10, %c0_11, %c0_12] : memref<2x1x128xf32, #tpu.memory_space<vmem>>, vector<1x1x128xf32>
    %13 = vector.shape_cast %12 : vector<1x1x128xf32> to vector<1x128xf32>
    %14 = vector.broadcast %13 : vector<1x128xf32> to vector<8x128xf32>
    %15 = arith.addf %11, %14 : vector<8x128xf32>
    %cst_13 = arith.constant 0.000000e+00 : f32
    %16 = vector.broadcast %cst_13 : f32 to vector<8x128xf32>
    %17 = arith.maximumf %15, %16 : vector<8x128xf32>
    %18 = arith.truncf %17 : vector<8x128xf32> to vector<8x128xbf16>
    %c1 = arith.constant 1 : index
    %c0_14 = arith.constant 0 : index
    %c0_15 = arith.constant 0 : index
    %19 = vector.load %arg4[%c1, %c0_14, %c0_15] : memref<2x128x128xbf16, #tpu.memory_space<vmem>>, vector<1x128x128xbf16>
    %20 = vector.shape_cast %19 : vector<1x128x128xbf16> to vector<128x128xbf16>
    %cst_16 = arith.constant dense<0.000000e+00> : vector<8x128xf32>
    %21 = tpu.matmul %18, %20, %cst_16 {dimension_numbers = #tpu.dot_dimension_numbers<[1], [0], [0], [1], [0, 0, 1, 1], [], []>} : vector<8x128xbf16>, vector<128x128xbf16>, vector<8x128xf32> -> vector<8x128xf32>
    %c1_17 = arith.constant 1 : index
    %c0_18 = arith.constant 0 : index
    %c0_19 = arith.constant 0 : index
    %22 = vector.load %arg5[%c1_17, %c0_18, %c0_19] : memref<2x1x128xf32, #tpu.memory_space<vmem>>, vector<1x1x128xf32>
    %23 = vector.shape_cast %22 : vector<1x1x128xf32> to vector<1x128xf32>
    %24 = vector.broadcast %23 : vector<1x128xf32> to vector<8x128xf32>
    %25 = arith.addf %21, %24 : vector<8x128xf32>
    %cst_20 = arith.constant 0.000000e+00 : f32
    %26 = vector.broadcast %cst_20 : f32 to vector<8x128xf32>
    %27 = arith.maximumf %25, %26 : vector<8x128xf32>
    %28 = arith.truncf %27 : vector<8x128xf32> to vector<8x128xbf16>
    %c0_21 = arith.constant 0 : index
    %c0_22 = arith.constant 0 : index
    %29 = vector.load %arg6[%c0_21, %c0_22] : memref<128x128xbf16, #tpu.memory_space<vmem>>, vector<128x128xbf16>
    %cst_23 = arith.constant dense<0.000000e+00> : vector<8x128xf32>
    %30 = tpu.matmul %28, %29, %cst_23 {dimension_numbers = #tpu.dot_dimension_numbers<[1], [0], [0], [1], [0, 0, 1, 1], [], []>} : vector<8x128xbf16>, vector<128x128xbf16>, vector<8x128xf32> -> vector<8x128xf32>
    %c0_24 = arith.constant 0 : index
    %c0_25 = arith.constant 0 : index
    %31 = vector.load %arg7[%c0_24, %c0_25] : memref<1x128xf32, #tpu.memory_space<vmem>>, vector<1x128xf32>
    %32 = vector.broadcast %31 : vector<1x128xf32> to vector<8x128xf32>
    %33 = arith.addf %30, %32 : vector<8x128xf32>
    %c0_26 = arith.constant 0 : index
    %c0_27 = arith.constant 0 : index
    %34 = vector.load %arg8[%c0_26, %c0_27] : memref<8x128xf32, #tpu.memory_space<vmem>>, vector<8x128xf32>
    tpu.vector_store %arg8[%c0_26, %c0_27], %33 {strides = array<i32>} : memref<8x128xf32, #tpu.memory_space<vmem>>, vector<8x128xf32>,
    return
  }
  func.func @transform_0(%arg0: i32) -> (i32, i32) {
    %c0_i32 = arith.constant 0 : i32
    %c0_i32_0 = arith.constant 0 : i32
    return %arg0, %c0_i32 : i32, i32
  }
  func.func @transform_1(%arg0: i32) -> (i32, i32) {
    %c0_i32 = arith.constant 0 : i32
    %c0_i32_0 = arith.constant 0 : i32
    %c0_i32_1 = arith.constant 0 : i32
    return %c0_i32, %c0_i32_0 : i32, i32
  }
  func.func @transform_2(%arg0: i32) -> (i32, i32) {
    %c0_i32 = arith.constant 0 : i32
    %c0_i32_0 = arith.constant 0 : i32
    %c0_i32_1 = arith.constant 0 : i32
    return %c0_i32, %c0_i32_0 : i32, i32
  }
  func.func @transform_3(%arg0: i32) -> (i32, i32, i32) {
    %c0_i32 = arith.constant 0 : i32
    %c0_i32_0 = arith.constant 0 : i32
    %c0_i32_1 = arith.constant 0 : i32
    %c0_i32_2 = arith.constant 0 : i32
    return %c0_i32, %c0_i32_0, %c0_i32_1 : i32, i32, i32
  }
  func.func @transform_4(%arg0: i32) -> (i32, i32, i32) {
    %c0_i32 = arith.constant 0 : i32
    %c0_i32_0 = arith.constant 0 : i32
    %c0_i32_1 = arith.constant 0 : i32
    %c0_i32_2 = arith.constant 0 : i32
    return %c0_i32, %c0_i32_0, %c0_i32_1 : i32, i32, i32
  }
  func.func @transform_5(%arg0: i32) -> (i32, i32) {
    %c0_i32 = arith.constant 0 : i32
    %c0_i32_0 = arith.constant 0 : i32
    %c0_i32_1 = arith.constant 0 : i32
    return %c0_i32, %c0_i32_0 : i32, i32
  }
  func.func @transform_6(%arg0: i32) -> (i32, i32) {
    %c0_i32 = arith.constant 0 : i32
    %c0_i32_0 = arith.constant 0 : i32
    %c0_i32_1 = arith.constant 0 : i32
    return %c0_i32, %c0_i32_0 : i32, i32
  }
  func.func @transform_7(%arg0: i32) -> (i32, i32) {
    %c0_i32 = arith.constant 0 : i32
    %c0_i32_0 = arith.constant 0 : i32
    return %arg0, %c0_i32 : i32, i32
  }
}

</mosaic_0001>

<bundles_post_ra>
// kernel: tpu_custom_call.1
= control target key start
LH: loop header
LB: loop body
LE: loop exit
PB: predicated region body
PF: predicated region fallthrough
CT: control target
= control target key end

     0   :  { %12 = vsyncpa [#allocation3], 0  ;;  %s815_s0 = inlined_call_operand.hbm [shape: bf16[8,128], index: 0, kind: input, shape index: {}]   ;;  %s816_s1 = inlined_call_operand.hbm [shape: bf16[128,128], index: 1, kind: input, shape index: {}]   ;;  %s817_s2 = inlined_call_operand.vmem [shape: f32[1,128], index: 2, kind: input, shape index: {}]   ;;  %s818_s3 = inlined_call_operand.hbm [shape: bf16[2,128,128], index: 3, kind: input, shape index: {}]   ;;  %s819_s4 = inlined_call_operand.vmem [shape: f32[2,1,128], index: 4, kind: input, shape index: {}]   ;;  %s820_s5 = inlined_call_operand.hbm [shape: bf16[128,128], index: 5, kind: input, shape index: {}]   ;;  %s821_s6 = inlined_call_operand.vmem [shape: f32[1,128], index: 6, kind: input, shape index: {}]   ;;  %s822_s7 = inlined_call_operand.hbm [shape: f32[8,128], index: 7, kind: output, shape index: {}]  }
   0x1   :  { %13 = vsyncpa [#allocation6], 0 }
   0x2   :  { %14 = vsyncpa [#allocation9], 0  ;;  %s31_s26 = sshll.u32 %s816_s1, 4  ;;  %s32_s26 = int_to_ptr.hbm [resolvable:$true] %s31_s26 }
   0x3   :  { %15 = vsyncpa [#allocation4], 0  ;;  %s741_s27 = smov [#allocation5]   ;;  %s21_s8 = sshll.u32 %s815_s0, 4  ;;  %s22_s8 = int_to_ptr.hbm [resolvable:$true] %s21_s8 }
   0x4   :  { %s33_s28 = sshll.u32 %s741_s27, 4  ;;  %s742_s9 = smov 64   ;;  %s34_s28 = int_to_ptr.vmem [resolvable:$true] %s33_s28 }
   0x5   :  { %s743_s10 = smov 4   ;;  %s744_s11 = smov [#allocation2]  }
   0x6   :  { %39 = dma.hbm_to_vmem [thread:$0]  %s32_s26, 1024, %s34_s28, [#allocation6], %s742_s9, %s742_s9, %s743_s10  }
   0x7   :  { %s23_s12 = sshll.u32 %s744_s11, 4  ;;  %s46_s15 = sshll.u32 %s818_s3, 4  ;;  %s24_s12 = int_to_ptr.vmem [resolvable:$true] %s23_s12  ;;  %s47_s15 = int_to_ptr.hbm [resolvable:$true] %s46_s15 }
   0x8   :  { %26 = dma.hbm_to_vmem [thread:$0]  %s22_s8, 64, %s24_s12, [#allocation3]  }
   0x9   :  { %s61_s17 = sshll.u32 %s820_s5, 4  ;;  %s745_s18 = smov [#allocation7]   ;;  %s62_s17 = int_to_ptr.hbm [resolvable:$true] %s61_s17 }
   0xa   :  { %s48_s19 = sshll.u32 %s745_s18, 4  ;;  %s746_s0 = smov [#allocation8]   ;;  %s49_s19 = int_to_ptr.vmem [resolvable:$true] %s48_s19 }
   0xb   :  { %54 = dma.hbm_to_vmem [thread:$0]  %s47_s15, 2048, %s49_s19, [#allocation6], %s742_s9, %s742_s9, %s743_s10  }
   0xc   :  { %s63_s20 = sshll.u32 %s746_s0, 4  ;;  %s64_s20 = int_to_ptr.vmem [resolvable:$true] %s63_s20 }
   0xd   :  { %69 = dma.hbm_to_vmem [thread:$0]  %s62_s17, 1024, %s64_s20, [#allocation9], %s742_s9, %s742_s9, %s743_s10  }
   0xe   :  { %733 = dma.done.wait [#allocation3], 64  }
   0xf   :  { %734 = vsyncadd [#allocation3], 4294967232 }
  0x10   :  { %735 = dma.done.wait [#allocation6], 3072  }
  0x11   :  { %736 = vsyncadd [#allocation6], 4294964224 }
  0x12   :  { %737 = dma.done.wait [#allocation9], 1024  }
  0x13   :  { %738 = vsyncadd [#allocation9], 4294966272  ;;  %v577_v0 = vld [vmem:[#allocation5 + $0x38] sm:$0xff]  ;;  %v576_v1 = vld [vmem:[#allocation5 + $0x30] sm:$0xff]  ;;  %s747_s26 = smov [#allocation10]   ;;  %s429_s30 = sshll.u32 %s822_s7, 4  ;;  %s430_s30 = int_to_ptr.hbm [resolvable:$true] %s429_s30 }
  0x14   :  { %157 = vmatpush.bf16.msra.mxu0 %v577_v0  ;;  %v585_v2 = vld [vmem:[#allocation7 + $0x38] sm:$0xff]  ;;  %v584_v3 = vld [vmem:[#allocation7 + $0x30] sm:$0xff]  ;;  %v575_v4 = vld [vmem:[#allocation5 + $0x28] sm:$0xff]  ;;  %s427_s27 = sshll.u32 %s747_s26, 4  ;;  %s428_s27 = int_to_ptr.vmem [resolvable:$true] %s427_s27 }
  0x15   :  { %240 = vmatpush.bf16.msra.mxu1 %v585_v2  ;;  %v583_v5 = vld [vmem:[#allocation7 + $0x28] sm:$0xff]  ;;  %v574_v6 = vld [vmem:[#allocation5 + $0x20] sm:$0xff]  ;;  %v573_v8 = vld [vmem:[#allocation5 + $0x18] sm:$0xff] }
  0x16   :  { %v582_v7 = vld [vmem:[#allocation7 + $0x20] sm:$0xff]  ;;  %v581_v9 = vld [vmem:[#allocation7 + $0x18] sm:$0xff]  ;;  %v572_v10 = vld [vmem:[#allocation5 + $0x10] sm:$0xff] }
  0x17   :  { %v580_v11 = vld [vmem:[#allocation7 + $0x10] sm:$0xff]  ;;  %v571_v12 = vld [vmem:[#allocation5 + $0x8] sm:$0xff]  ;;  %v570_v13 = vld [vmem:[#allocation5] sm:$0xff] }
  0x18   :  { %158 = vmatpush.bf16.msra.mxu0 %v576_v1  ;;  %v88_v14 = vld [vmem:[#allocation2] sm:$0xf]  ;;  %v579_v15 = vld [vmem:[#allocation7 + $0x8] sm:$0xff]  ;;  %v578_v16 = vld [vmem:[#allocation7] sm:$0xff] }
  0x19   :  { %241 = vmatpush.bf16.msra.mxu1 %v584_v3  ;;  %v593_v17 = vld [vmem:[#allocation7 + $0x78] sm:$0xff]  ;;  %v592_v18 = vld [vmem:[#allocation7 + $0x70] sm:$0xff]  ;;  %v591_v19 = vld [vmem:[#allocation7 + $0x68] sm:$0xff] }
  0x1a   :  { %325 = vmatpush.bf16.msra.mxu2 %v593_v17  ;;  %v590_v20 = vld [vmem:[#allocation7 + $0x60] sm:$0xff]  ;;  %v589_v21 = vld [vmem:[#allocation7 + $0x58] sm:$0xff]  ;;  %v588_v22 = vld [vmem:[#allocation7 + $0x50] sm:$0xff] }
  0x1b   :  { %v609_v23 = vld [vmem:[%s817_s2] ss:$0 sm:$0xff]  ;;  %v587_v29 = vld [vmem:[#allocation7 + $0x48] sm:$0xff]  ;;  %v586_v30 = vld [vmem:[#allocation7 + $0x40] sm:$0xff] }
  0x1c   :  { %159 = vmatpush.bf16.msra.mxu0 %v575_v4  ;;  %v601_v31 = vld [vmem:[#allocation8 + $0x38] sm:$0xff]  ;;  %v600_v32 = vld [vmem:[#allocation8 + $0x30] sm:$0xff]  ;;  %v599_v33 = vld [vmem:[#allocation8 + $0x28] sm:$0xff] }
  0x1d   :  { %242 = vmatpush.bf16.msra.mxu1 %v583_v5  ;;  %408 = vmatpush.bf16.msra.mxu3 %v601_v31  ;;  %v598_v34 = vld [vmem:[#allocation8 + $0x20] sm:$0xff]  ;;  %v597_v35 = vld [vmem:[#allocation8 + $0x18] sm:$0xff]  ;;  %v596_v36 = vld [vmem:[#allocation8 + $0x10] sm:$0xff] }
  0x1e   :  { %326 = vmatpush.bf16.msra.mxu2 %v592_v18  ;;  %v610_v37 = vld [vmem:[%s819_s4] ss:$0 sm:$0xff]  ;;  %v595_v43 = vld [vmem:[#allocation8 + $0x8] sm:$0xff]  ;;  %v594_v44 = vld [vmem:[#allocation8] sm:$0xff] }
  0x1f   :  { %v611_v45 = vld [vmem:[%s819_s4 + $0x1] ss:$0 sm:$0xff]  ;;  %v612_v51 = vld [vmem:[%s821_s6] ss:$0 sm:$0xff] }
  0x20   :  { %160 = vmatpush.bf16.msra.mxu0 %v574_v6 }
  0x21   :  { %243 = vmatpush.bf16.msra.mxu1 %v582_v7  ;;  %409 = vmatpush.bf16.msra.mxu3 %v600_v32 }
  0x22   :  { %327 = vmatpush.bf16.msra.mxu2 %v591_v19 }
  0x24   :  { %161 = vmatpush.bf16.msra.mxu0 %v573_v8 }
  0x25   :  { %244 = vmatpush.bf16.msra.mxu1 %v581_v9  ;;  %410 = vmatpush.bf16.msra.mxu3 %v599_v33 }
  0x26   :  { %328 = vmatpush.bf16.msra.mxu2 %v590_v20 }
  0x28   :  { %162 = vmatpush.bf16.msra.mxu0 %v572_v10 }
  0x29   :  { %245 = vmatpush.bf16.msra.mxu1 %v580_v11  ;;  %411 = vmatpush.bf16.msra.mxu3 %v598_v34 }
  0x2a   :  { %329 = vmatpush.bf16.msra.mxu2 %v589_v21 }
  0x2c   :  { %163 = vmatpush.bf16.msra.mxu0 %v571_v12 }
  0x2d   :  { %246 = vmatpush.bf16.msra.mxu1 %v579_v15  ;;  %412 = vmatpush.bf16.msra.mxu3 %v597_v35 }
  0x2e   :  { %330 = vmatpush.bf16.msra.mxu2 %v588_v22 }
  0x30   :  { %164 = vmatpush.bf16.msra.mxu0 %v570_v13 }
  0x31   :  { %247 = vmatpush.bf16.msra.mxu1 %v578_v16  ;;  %413 = vmatpush.bf16.msra.mxu3 %v596_v36 }
  0x32   :  { %331 = vmatpush.bf16.msra.mxu2 %v587_v29 }
  0x33   :  { %165 = vmatmul.bf16.vlgmr.msra.gmra.mxu0 %v88_v14 }
  0x35   :  { %414 = vmatpush.bf16.msra.mxu3 %v595_v43 }
  0x36   :  { %332 = vmatpush.bf16.msra.mxu2 %v586_v30 }
  0x39   :  { %415 = vmatpush.bf16.msra.mxu3 %v594_v44 }
  0xb0   :  { %v166_v24 = vpop.f32.mrf.mxu0 }
  0xb1   :  { %v167_v25 = vadd.f32 %v609_v23, %v166_v24 }
  0xb3   :  { %v170_v26 = vmax.f32 %v167_v25, 0.0 }
  0xb5   :  { %v171_v27 = vpack.c.bf16 %v170_v26, %v170_v26 }
  0xb7   :  { %248 = vmatmul.bf16.vlgmr.msra.gmra.mxu1 %v171_v27 }
  0xb8   :  { %v168_v28 = vpop.f32.mrf.mxu0 }
 0x134   :  { %v249_v38 = vpop.f32.mrf.mxu1 }
 0x135   :  { %v250_v39 = vadd.f32 %v610_v37, %v249_v38 }
 0x137   :  { %v253_v40 = vmax.f32 %v250_v39, 0.0 }
 0x139   :  { %v254_v41 = vpack.c.bf16 %v253_v40, %v253_v40 }
 0x13b   :  { %333 = vmatmul.bf16.vlgmr.msra.gmra.mxu2 %v254_v41 }
 0x13c   :  { %v251_v42 = vpop.f32.mrf.mxu1 }
 0x1be   :  { %v334_v46 = vpop.f32.mrf.mxu2 }
 0x1bf   :  { %v335_v47 = vadd.f32 %v611_v45, %v334_v46 }
 0x1c1   :  { %v338_v48 = vmax.f32 %v335_v47, 0.0 }
 0x1c3   :  { %v339_v49 = vpack.c.bf16 %v338_v48, %v338_v48 }
 0x1c5   :  { %416 = vmatmul.bf16.vlgmr.msra.gmra.mxu3 %v339_v49 }
 0x1c6   :  { %v336_v50 = vpop.f32.mrf.mxu2 }
 0x248   :  { %v417_v52 = vpop.f32.mrf.mxu3 }
 0x249   :  { %v418_v53 = vadd.f32 %v612_v51, %v417_v52 }
 0x24b   :  { %421 = vst [vmem:[#allocation10] sm:$0xff] %v418_v53 }
 0x24c   :  { %432 = dma.vmem_to_hbm [thread:$0]  %s428_s27, 128, %s430_s30, [#allocation4]  }
 0x250   :  { %v419_v54 = vpop.f32.mrf.mxu3 }
 0x251   :  { %739 = dma.done.wait [#allocation4], 128  }
 0x252   :  { %740 = vsyncadd [#allocation4], 4294967168 }
 0x253   :  { %437 = vsyncpa [#allocation3], 1 }
 0x254   :  { %438 = vsyncpa [#allocation6], 1 }
 0x255   :  { %439 = vsyncpa [#allocation9], 1 }
 0x256   :  { %440 = vsyncpa [#allocation4], 1 }

</bundles_post_ra>
